<compile_context>
chip_gen: v7x
topology: tpu7x:2x2x1
jax: 0.10.0
libtpu: 0.0.40
codegen_flags: <defaults>
</compile_context>

<pallas_src>
import jax
import jax.numpy as jnp
from jax.experimental import pallas as pl
from jax.experimental.pallas import tpu as pltpu

D = 128  # attention_dim == GRU hidden size == GRU input size (forced by the module)


def _round_up(x, m):
    return ((x + m - 1) // m) * m


def attention_kernel(x_ref, v_ref, h_ref, wih_t_ref, whh_t_ref, b_ref, o_ref):
    # x_ref: (Bblk, T, D), v_ref/h_ref: (Bblk, D),
    # wih_t_ref/whh_t_ref: (D, 3D), b_ref: (2, 3D), o_ref: (Bblk, 2D)
    x = x_ref[...]                                   # (Bblk, T, D)
    v = v_ref[...]                                   # (Bblk, D)  == h @ W
    h = h_ref[...]                                   # (Bblk, D)

    # Attention scores: e[b,t] = x[b,t,:] . v[b,:]   (VPU mul + lane reduce)
    e = jnp.sum(x * v[:, None, :], axis=2)           # (Bblk, T)

    # Softmax over the sequence axis T (PyTorch dim=1 of (B, T, 1)).
    e = e - jnp.max(e, axis=1, keepdims=True)
    p = jnp.exp(e)
    denom = jnp.sum(p, axis=1, keepdims=True)
    p = p / denom                                    # exact divide (correctness)

    # Weighted context: ctx[b,d] = sum_t p[b,t] * x[b,t,d]
    ctx = jnp.sum(p[:, :, None] * x, axis=1)         # (Bblk, D)

    # Single GRU step (PyTorch gate order: r, z, n).  MXU matmuls with M=Bblk.
    gi = jnp.dot(ctx, wih_t_ref[...],
                 preferred_element_type=jnp.float32) + b_ref[0:1, :]   # (Bblk, 3D)
    gh = jnp.dot(h, whh_t_ref[...],
                 preferred_element_type=jnp.float32) + b_ref[1:2, :]   # (Bblk, 3D)

    r = jax.nn.sigmoid(gi[:, 0:D] + gh[:, 0:D])
    z = jax.nn.sigmoid(gi[:, D:2 * D] + gh[:, D:2 * D])
    n = jnp.tanh(gi[:, 2 * D:3 * D] + r * gh[:, 2 * D:3 * D])
    h_new = (1.0 - z) * n + z * h                    # (Bblk, D)

    # output = cat([aux_context, context], dim=2).squeeze(1) -> lane-dense store
    o_ref[:, 0:D] = h_new
    o_ref[:, D:2 * D] = ctx


def attention_forward(x, hidden, w, w_ih, w_hh, b_ih, b_hh, *, block_b=128):
    """x: (B, T, D); hidden: (1, B, D); returns (B, 2*D)."""
    B, T, Dm = x.shape
    assert Dm == D, f"attention_dim must be {D}, got {Dm}"

    h = hidden[0]                                    # (B, D)
    # Hoisted projection: v = h @ W  (replaces the per-token x @ W^T entirely,
    # since (x W^T) . h == x . (h W)).  Full-f32 to match PyTorch semantics.
    v = jnp.dot(h, w, precision=jax.lax.Precision.HIGHEST)  # (B, D)
    wih_t = w_ih.T                                   # (D, 3D)
    whh_t = w_hh.T                                   # (D, 3D)
    b = jnp.stack([b_ih, b_hh], axis=0)              # (2, 3D)

    # Batch blocking: multiple of 8 (sublane), up to `block_b` for big batches.
    bblk = block_b if B >= block_b else _round_up(B, 8)
    Bp = _round_up(B, bblk)
    if Bp != B:
        pad = Bp - B
        x = jnp.pad(x, ((0, pad), (0, 0), (0, 0)))
        h = jnp.pad(h, ((0, pad), (0, 0)))
        v = jnp.pad(v, ((0, pad), (0, 0)))

    out = pl.pallas_call(
        attention_kernel,
        out_shape=jax.ShapeDtypeStruct((Bp, 2 * D), jnp.float32),
        grid_spec=pltpu.PrefetchScalarGridSpec(
            num_scalar_prefetch=0,
            grid=(Bp // bblk,),
            in_specs=[
                pl.BlockSpec((bblk, T, D), lambda i: (i, 0, 0)),    # x slab
                pl.BlockSpec((bblk, D), lambda i: (i, 0)),          # v = h @ W
                pl.BlockSpec((bblk, D), lambda i: (i, 0)),          # h
                pl.BlockSpec((D, 3 * D), lambda i: (0, 0)),         # W_ih^T (resident)
                pl.BlockSpec((D, 3 * D), lambda i: (0, 0)),         # W_hh^T (resident)
                pl.BlockSpec((2, 3 * D), lambda i: (0, 0)),         # [b_ih; b_hh]
            ],
            out_specs=pl.BlockSpec((bblk, 2 * D), lambda i: (i, 0)),
        ),
        compiler_params=pltpu.CompilerParams(
            dimension_semantics=("parallel",)),     # batch axis: megacore-shardable
    )(x, v, h, wih_t, whh_t, b)
    return out[:B]


def attention_reference(x, hidden, w, w_ih, w_hh, b_ih, b_hh):
    """Pure-JAX reference matching the PyTorch forward (true-f32 matmuls)."""
    P = jax.lax.Precision.HIGHEST
    h = hidden[0]                                        # (B, D)
    wx = jnp.einsum('btk,jk->btj', x, w, precision=P)    # (B, T, D)  == Linear(x)
    e = jnp.einsum('btd,bd->bt', wx, h, precision=P)     # (B, T)
    p = jax.nn.softmax(e, axis=1)                        # softmax over T
    ctx = jnp.einsum('bt,btd->bd', p, x, precision=P)    # (B, D)
    gi = jnp.dot(ctx, w_ih.T, precision=P) + b_ih
    gh = jnp.dot(h, w_hh.T, precision=P) + b_hh
    r = jax.nn.sigmoid(gi[:, :D] + gh[:, :D])
    z = jax.nn.sigmoid(gi[:, D:2 * D] + gh[:, D:2 * D])
    n = jnp.tanh(gi[:, 2 * D:] + r * gh[:, 2 * D:])
    h_new = (1.0 - z) * n + z * h
    return jnp.concatenate([h_new, ctx], axis=1)


def _run_case(key, B, T):
    ks = jax.random.split(key, 7)
    scale = 1.0 / jnp.sqrt(jnp.float32(D))
    x = jax.random.normal(ks[0], (B, T, D), jnp.float32)
    hidden = jax.random.normal(ks[1], (1, B, D), jnp.float32)
    w = jax.random.normal(ks[2], (D, D), jnp.float32) * scale         # Linear weight
    w_ih = jax.random.normal(ks[3], (3 * D, D), jnp.float32) * scale  # GRU weight_ih_l0
    w_hh = jax.random.normal(ks[4], (3 * D, D), jnp.float32) * scale  # GRU weight_hh_l0
    b_ih = jax.random.normal(ks[5], (3 * D,), jnp.float32) * scale    # GRU bias_ih_l0
    b_hh = jax.random.normal(ks[6], (3 * D,), jnp.float32) * scale    # GRU bias_hh_l0

    out = attention_forward(x, hidden, w, w_ih, w_hh, b_ih, b_hh)
    jax.block_until_ready(out)
    ref = attention_reference(x, hidden, w, w_ih, w_hh, b_ih, b_hh)
    assert out.shape == (B, 2 * D), out.shape
    # Tolerance accounts for the score-path reassociation (v = h@W hoist) and
    # MXU vs. XLA f32 accumulation-order differences, amplified through exp().
    assert jnp.allclose(out, ref, atol=2e-3, rtol=2e-3), \
        float(jnp.max(jnp.abs(out - ref)))


if __name__ == "__main__":
    key = jax.random.PRNGKey(0)
    k1, k2 = jax.random.split(key)
    _run_case(k1, B=2, T=8)    # tiny batch: padded to one (8, T, D) block
    _run_case(k2, B=20, T=16)  # multi-block grid + padding path
    print("KERNEL_OK")
</pallas_src>

<mosaic_0001>
module attributes {stable_mosaic.version = 11 : i64} {
  func.func @attention_kernel(%arg0: i32, %arg1: memref<8x8x128xf32, #tpu.memory_space<vmem>>, %arg2: memref<8x128xf32, #tpu.memory_space<vmem>>, %arg3: memref<8x128xf32, #tpu.memory_space<vmem>>, %arg4: memref<128x384xf32, #tpu.memory_space<vmem>>, %arg5: memref<128x384xf32, #tpu.memory_space<vmem>>, %arg6: memref<2x384xf32, #tpu.memory_space<vmem>>, %arg7: memref<8x256xf32, #tpu.memory_space<vmem>>) attributes {dimension_semantics = [#tpu.dimension_semantics<parallel>], iteration_bounds = array<i64: 1>, scalar_prefetch = 0 : i64, scratch_operands = 0 : i64, tpu.core_type = #tpu.core_type<tc>, window_params = [{transform_indices = @transform_0, window_bounds = array<i64: 8, 8, 128>}, {transform_indices = @transform_1, window_bounds = array<i64: 8, 128>}, {transform_indices = @transform_2, window_bounds = array<i64: 8, 128>}, {pipeline_mode = #tpu.pipeline_mode<synchronous>, transform_indices = @transform_3, window_bounds = array<i64: 128, 384>}, {pipeline_mode = #tpu.pipeline_mode<synchronous>, transform_indices = @transform_4, window_bounds = array<i64: 128, 384>}, {pipeline_mode = #tpu.pipeline_mode<synchronous>, transform_indices = @transform_5, window_bounds = array<i64: 2, 384>}, {transform_indices = @transform_6, window_bounds = array<i64: 8, 256>}]} {
    %c0 = arith.constant 0 : index
    %c0_0 = arith.constant 0 : index
    %c0_1 = arith.constant 0 : index
    %0 = vector.load %arg1[%c0, %c0_0, %c0_1] : memref<8x8x128xf32, #tpu.memory_space<vmem>>, vector<8x8x128xf32>
    %c0_2 = arith.constant 0 : index
    %c0_3 = arith.constant 0 : index
    %1 = vector.load %arg2[%c0_2, %c0_3] : memref<8x128xf32, #tpu.memory_space<vmem>>, vector<8x128xf32>
    %c0_4 = arith.constant 0 : index
    %c0_5 = arith.constant 0 : index
    %2 = vector.load %arg3[%c0_4, %c0_5] : memref<8x128xf32, #tpu.memory_space<vmem>>, vector<8x128xf32>
    %3 = vector.shape_cast %1 : vector<8x128xf32> to vector<8x1x128xf32>
    %4 = vector.broadcast %3 : vector<8x1x128xf32> to vector<8x8x128xf32>
    %5 = arith.mulf %0, %4 : vector<8x8x128xf32>
    %cst = arith.constant dense<0.000000e+00> : vector<8x8xf32>
    %6 = vector.multi_reduction <add>, %5, %cst [2] : vector<8x8x128xf32> to vector<8x8xf32>
    %cst_6 = arith.constant dense<0xFF800000> : vector<8xf32>
    %7 = vector.multi_reduction <maximumf>, %6, %cst_6 [1] : vector<8x8xf32> to vector<8xf32>
    %8 = vector.shape_cast %7 : vector<8xf32> to vector<8x1xf32>
    %9 = vector.broadcast %8 : vector<8x1xf32> to vector<8x8xf32>
    %10 = arith.subf %6, %9 : vector<8x8xf32>
    %11 = math.exp %10 : vector<8x8xf32>
    %cst_7 = arith.constant dense<0.000000e+00> : vector<8xf32>
    %12 = vector.multi_reduction <add>, %11, %cst_7 [1] : vector<8x8xf32> to vector<8xf32>
    %13 = vector.shape_cast %12 : vector<8xf32> to vector<8x1xf32>
    %14 = vector.broadcast %13 : vector<8x1xf32> to vector<8x8xf32>
    %15 = arith.divf %11, %14 : vector<8x8xf32>
    %16 = vector.shape_cast %15 : vector<8x8xf32> to vector<8x8x1xf32>
    %17 = vector.broadcast %16 : vector<8x8x1xf32> to vector<8x8x128xf32>
    %18 = arith.mulf %17, %0 : vector<8x8x128xf32>
    %cst_8 = arith.constant dense<0.000000e+00> : vector<8x128xf32>
    %19 = vector.multi_reduction <add>, %18, %cst_8 [1] : vector<8x8x128xf32> to vector<8x128xf32>
    %c0_9 = arith.constant 0 : index
    %c0_10 = arith.constant 0 : index
    %20 = vector.load %arg4[%c0_9, %c0_10] : memref<128x384xf32, #tpu.memory_space<vmem>>, vector<128x384xf32>
    %cst_11 = arith.constant dense<0.000000e+00> : vector<8x384xf32>
    %21 = tpu.matmul %19, %20, %cst_11 {dimension_numbers = #tpu.dot_dimension_numbers<[1], [0], [0], [1], [0, 0, 1, 1], [], []>} : vector<8x128xf32>, vector<128x384xf32>, vector<8x384xf32> -> vector<8x384xf32>
    %c0_12 = arith.constant 0 : index
    %c0_13 = arith.constant 0 : index
    %22 = vector.load %arg6[%c0_12, %c0_13] : memref<2x384xf32, #tpu.memory_space<vmem>>, vector<1x384xf32>
    %23 = vector.broadcast %22 : vector<1x384xf32> to vector<8x384xf32>
    %24 = arith.addf %21, %23 : vector<8x384xf32>
    %c0_14 = arith.constant 0 : index
    %c0_15 = arith.constant 0 : index
    %25 = vector.load %arg5[%c0_14, %c0_15] : memref<128x384xf32, #tpu.memory_space<vmem>>, vector<128x384xf32>
    %cst_16 = arith.constant dense<0.000000e+00> : vector<8x384xf32>
    %26 = tpu.matmul %2, %25, %cst_16 {dimension_numbers = #tpu.dot_dimension_numbers<[1], [0], [0], [1], [0, 0, 1, 1], [], []>} : vector<8x128xf32>, vector<128x384xf32>, vector<8x384xf32> -> vector<8x384xf32>
    %c1 = arith.constant 1 : index
    %c0_17 = arith.constant 0 : index
    %27 = vector.load %arg6[%c1, %c0_17] : memref<2x384xf32, #tpu.memory_space<vmem>>, vector<1x384xf32>
    %28 = vector.broadcast %27 : vector<1x384xf32> to vector<8x384xf32>
    %29 = arith.addf %26, %28 : vector<8x384xf32>
    %30 = vector.extract_strided_slice %24 {offsets = [0, 0], sizes = [8, 128], strides = [1, 1]} : vector<8x384xf32> to vector<8x128xf32>
    %31 = vector.extract_strided_slice %29 {offsets = [0, 0], sizes = [8, 128], strides = [1, 1]} : vector<8x384xf32> to vector<8x128xf32>
    %32 = arith.addf %30, %31 : vector<8x128xf32>
    %33 = arith.negf %32 : vector<8x128xf32>
    %34 = math.exp %33 : vector<8x128xf32>
    %cst_18 = arith.constant 1.000000e+00 : f32
    %35 = vector.broadcast %cst_18 : f32 to vector<8x128xf32>
    %36 = arith.addf %35, %34 : vector<8x128xf32>
    %37 = arith.divf %35, %36 : vector<8x128xf32>
    %38 = vector.extract_strided_slice %24 {offsets = [0, 128], sizes = [8, 128], strides = [1, 1]} : vector<8x384xf32> to vector<8x128xf32>
    %39 = vector.extract_strided_slice %29 {offsets = [0, 128], sizes = [8, 128], strides = [1, 1]} : vector<8x384xf32> to vector<8x128xf32>
    %40 = arith.addf %38, %39 : vector<8x128xf32>
    %41 = arith.negf %40 : vector<8x128xf32>
    %42 = math.exp %41 : vector<8x128xf32>
    %cst_19 = arith.constant 1.000000e+00 : f32
    %43 = vector.broadcast %cst_19 : f32 to vector<8x128xf32>
    %44 = arith.addf %43, %42 : vector<8x128xf32>
    %45 = arith.divf %43, %44 : vector<8x128xf32>
    %46 = vector.extract_strided_slice %24 {offsets = [0, 256], sizes = [8, 128], strides = [1, 1]} : vector<8x384xf32> to vector<8x128xf32>
    %47 = vector.extract_strided_slice %29 {offsets = [0, 256], sizes = [8, 128], strides = [1, 1]} : vector<8x384xf32> to vector<8x128xf32>
    %48 = arith.mulf %37, %47 : vector<8x128xf32>
    %49 = arith.addf %46, %48 : vector<8x128xf32>
    %50 = math.tanh %49 : vector<8x128xf32>
    %cst_20 = arith.constant 1.000000e+00 : f32
    %51 = vector.broadcast %cst_20 : f32 to vector<8x128xf32>
    %52 = arith.subf %51, %45 : vector<8x128xf32>
    %53 = arith.mulf %52, %50 : vector<8x128xf32>
    %54 = arith.mulf %45, %2 : vector<8x128xf32>
    %55 = arith.addf %53, %54 : vector<8x128xf32>
    %c0_21 = arith.constant 0 : index
    %c0_22 = arith.constant 0 : index
    %56 = vector.load %arg7[%c0_21, %c0_22] : memref<8x256xf32, #tpu.memory_space<vmem>>, vector<8x128xf32>
    tpu.vector_store %arg7[%c0_21, %c0_22], %55 {strides = array<i32>} : memref<8x256xf32, #tpu.memory_space<vmem>>, vector<8x128xf32>,
    %c0_23 = arith.constant 0 : index
    %c128 = arith.constant 128 : index
    %57 = vector.load %arg7[%c0_23, %c128] : memref<8x256xf32, #tpu.memory_space<vmem>>, vector<8x128xf32>
    tpu.vector_store %arg7[%c0_23, %c128], %19 {strides = array<i32>} : memref<8x256xf32, #tpu.memory_space<vmem>>, vector<8x128xf32>,
    return
  }
  func.func @transform_0(%arg0: i32) -> (i32, i32, i32) {
    %c0_i32 = arith.constant 0 : i32
    %c0_i32_0 = arith.constant 0 : i32
    %c0_i32_1 = arith.constant 0 : i32
    return %arg0, %c0_i32, %c0_i32_0 : i32, i32, i32
  }
  func.func @transform_1(%arg0: i32) -> (i32, i32) {
    %c0_i32 = arith.constant 0 : i32
    %c0_i32_0 = arith.constant 0 : i32
    return %arg0, %c0_i32 : i32, i32
  }
  func.func @transform_2(%arg0: i32) -> (i32, i32) {
    %c0_i32 = arith.constant 0 : i32
    %c0_i32_0 = arith.constant 0 : i32
    return %arg0, %c0_i32 : i32, i32
  }
  func.func @transform_3(%arg0: i32) -> (i32, i32) {
    %c0_i32 = arith.constant 0 : i32
    %c0_i32_0 = arith.constant 0 : i32
    %c0_i32_1 = arith.constant 0 : i32
    return %c0_i32, %c0_i32_0 : i32, i32
  }
  func.func @transform_4(%arg0: i32) -> (i32, i32) {
    %c0_i32 = arith.constant 0 : i32
    %c0_i32_0 = arith.constant 0 : i32
    %c0_i32_1 = arith.constant 0 : i32
    return %c0_i32, %c0_i32_0 : i32, i32
  }
  func.func @transform_5(%arg0: i32) -> (i32, i32) {
    %c0_i32 = arith.constant 0 : i32
    %c0_i32_0 = arith.constant 0 : i32
    %c0_i32_1 = arith.constant 0 : i32
    return %c0_i32, %c0_i32_0 : i32, i32
  }
  func.func @transform_6(%arg0: i32) -> (i32, i32) {
    %c0_i32 = arith.constant 0 : i32
    %c0_i32_0 = arith.constant 0 : i32
    return %arg0, %c0_i32 : i32, i32
  }
}

</mosaic_0001>

<bundles_post_ra>
// kernel: tpu_custom_call.1
= control target key start
LH: loop header
LB: loop body
LE: loop exit
PB: predicated region body
PF: predicated region fallthrough
CT: control target
= control target key end

     0   :  { %11 = vsyncpa [#allocation3], 0  ;;  %s1782_s0 = inlined_call_operand.hbm [shape: f32[8,8,128], index: 0, kind: input, shape index: {}]   ;;  %s1783_s1 = inlined_call_operand.hbm [shape: f32[8,128], index: 1, kind: input, shape index: {}]   ;;  %s1784_s2 = inlined_call_operand.hbm [shape: f32[8,128], index: 2, kind: input, shape index: {}]   ;;  %s1785_s3 = inlined_call_operand.hbm [shape: f32[128,384], index: 3, kind: input, shape index: {}]   ;;  %s1786_s4 = inlined_call_operand.hbm [shape: f32[128,384], index: 4, kind: input, shape index: {}]   ;;  %s1787_s5 = inlined_call_operand.vmem [shape: f32[2,384], index: 5, kind: input, shape index: {}]   ;;  %s1788_s6 = inlined_call_operand.hbm [shape: f32[8,256], index: 6, kind: output, shape index: {}]  }
   0x1   :  { %12 = vsyncpa [#allocation6], 0 }
   0x2   :  { %13 = vsyncpa [#allocation9], 0 }
   0x3   :  { %14 = vsyncpa [#allocation4], 0  ;;  %s1460_s21 = smov [#allocation5]   ;;  %s1461_s23 = smov [#allocation8]  }
   0x4   :  { %s33_s22 = sshll.u32 %s1460_s21, 4  ;;  %s52_s24 = sshll.u32 %s1461_s23, 4  ;;  %s34_s22 = int_to_ptr.vmem [resolvable:$true] %s33_s22  ;;  %s1510_s24 = int_to_ptr.vmem [resolvable:$true] %s52_s24 }
   0x5   :  { %s1320_s27 = scalar_lea.hbm %s1783_s1, 128 }
   0x6   :  { %p1321_p0 = scmp.ne.s32.totalorder %s1783_s1, %s1320_s27  ;;  %p1324_p1 = scmp.lt.u32.totalorder %s1320_s27, %s1783_s1 }
   0x8   :  { %p1326_p2 = pnand %p1324_p1, %p1321_p0 }
   0xa   :  { %1329 = shalt.err (!%p1326_p2)
}
   0xb   :  { %s1330_s8 = scalar_lea.vmem %s34_s22, 128  ;;  %p1335_p4 = scmp.lt.s32.totalorder %s34_s22, %s34_s22 }
   0xc   :  { %p1331_p3 = scmp.ne.s32.totalorder %s34_s22, %s1330_s8  ;;  %p1336_p5 = scmp.lt.s32.totalorder %s1330_s8, %s1330_s8 }
   0xe   :  { %p1337_p6 = por %p1336_p5, %p1335_p4 }
  0x10   :  { %p1338_p7 = pnand %p1337_p6, %p1331_p3 }
  0x12   :  { %1341 = shalt.err (!%p1338_p7)
}
  0x13   :  { %36 = dma.hbm_to_vmem [thread:$0]  %s1783_s1, 128, %s34_s22, [#allocation6]  }
  0x14   :  { %s1342_s13 = scalar_lea.hbm %s1785_s3, 6144 }
  0x15   :  { %p1343_p8 = scmp.ne.s32.totalorder %s1785_s3, %s1342_s13  ;;  %p1346_p9 = scmp.lt.u32.totalorder %s1342_s13, %s1785_s3 }
  0x17   :  { %p1348_p10 = pnand %p1346_p9, %p1343_p8 }
  0x19   :  { %1351 = shalt.err (!%p1348_p10)
}
  0x1a   :  { %s1352_s18 = scalar_lea.vmem %s1510_s24, 6144  ;;  %p1357_p12 = scmp.lt.s32.totalorder %s1510_s24, %s1510_s24 }
  0x1b   :  { %p1353_p11 = scmp.ne.s32.totalorder %s1510_s24, %s1352_s18  ;;  %p1358_p13 = scmp.lt.s32.totalorder %s1352_s18, %s1352_s18 }
  0x1d   :  { %p1359_p0 = por %p1358_p13, %p1357_p12 }
  0x1f   :  { %p1360_p1 = pnand %p1359_p0, %p1353_p11 }
  0x21   :  { %1363 = shalt.err (!%p1360_p1)
}
  0x22   :  { %s1462_s1 = smov 384   ;;  %s1463_s19 = smov 24  }
  0x23   :  { %58 = dma.hbm_to_vmem [thread:$0]  %s1785_s3, 6144, %s1510_s24, [#allocation9], %s1462_s1, %s1462_s1, %s1463_s19  }
  0x24   :  { %s1464_s22 = smov [#allocation2]   ;;  %s1364_s27 = scalar_lea.hbm %s1782_s0, 1024 }
  0x25   :  { %s20_s23 = sshll.u32 %s1464_s22, 4  ;;  %p1365_p2 = scmp.ne.s32.totalorder %s1782_s0, %s1364_s27  ;;  %s21_s23 = int_to_ptr.vmem [resolvable:$true] %s20_s23 }
  0x26   :  { %p1368_p3 = scmp.lt.u32.totalorder %s1364_s27, %s1782_s0 }
  0x28   :  { %p1370_p4 = pnand %p1368_p3, %p1365_p2 }
  0x2a   :  { %1373 = shalt.err (!%p1370_p4)
}
  0x2b   :  { %s1374_s8 = scalar_lea.vmem %s21_s23, 1024  ;;  %p1379_p6 = scmp.lt.s32.totalorder %s21_s23, %s21_s23 }
  0x2c   :  { %p1375_p5 = scmp.ne.s32.totalorder %s21_s23, %s1374_s8  ;;  %p1380_p7 = scmp.lt.s32.totalorder %s1374_s8, %s1374_s8 }
  0x2e   :  { %p1381_p8 = por %p1380_p7, %p1379_p6 }
  0x30   :  { %p1382_p9 = pnand %p1381_p8, %p1375_p5 }
  0x32   :  { %1385 = shalt.err (!%p1382_p9)
}
  0x33   :  { %s1465_s3 = smov 128   ;;  %s1466_s24 = smov 8  }
  0x34   :  { %26 = dma.hbm_to_vmem [thread:$0]  %s1782_s0, 1024, %s21_s23, [#allocation3], %s1465_s3, %s1465_s3, %s1466_s24  }
  0x35   :  { %s1467_s11 = smov [#allocation7]   ;;  %s1468_s13 = smov [#allocation10]  }
  0x36   :  { %s43_s12 = sshll.u32 %s1467_s11, 4  ;;  %s64_s14 = sshll.u32 %s1468_s13, 4  ;;  %s44_s12 = int_to_ptr.vmem [resolvable:$true] %s43_s12  ;;  %s65_s14 = int_to_ptr.vmem [resolvable:$true] %s64_s14 }
  0x37   :  { %s1386_s17 = scalar_lea.hbm %s1784_s2, 128 }
  0x38   :  { %p1387_p10 = scmp.ne.s32.totalorder %s1784_s2, %s1386_s17  ;;  %p1390_p11 = scmp.lt.u32.totalorder %s1386_s17, %s1784_s2 }
  0x3a   :  { %p1392_p12 = pnand %p1390_p11, %p1387_p10 }
  0x3c   :  { %1395 = shalt.err (!%p1392_p12)
}
  0x3d   :  { %s1396_s0 = scalar_lea.vmem %s44_s12, 128  ;;  %p1401_p0 = scmp.lt.s32.totalorder %s44_s12, %s44_s12 }
  0x3e   :  { %p1397_p13 = scmp.ne.s32.totalorder %s44_s12, %s1396_s0  ;;  %p1402_p1 = scmp.lt.s32.totalorder %s1396_s0, %s1396_s0 }
  0x40   :  { %p1403_p2 = por %p1402_p1, %p1401_p0 }
  0x42   :  { %p1404_p3 = pnand %p1403_p2, %p1397_p13 }
  0x44   :  { %1407 = shalt.err (!%p1404_p3)
}
  0x45   :  { %46 = dma.hbm_to_vmem [thread:$0]  %s1784_s2, 128, %s44_s12, [#allocation6]  }
  0x46   :  { %s1408_s28 = scalar_lea.hbm %s1786_s4, 6144 }
  0x47   :  { %p1409_p4 = scmp.ne.s32.totalorder %s1786_s4, %s1408_s28  ;;  %p1412_p5 = scmp.lt.u32.totalorder %s1408_s28, %s1786_s4 }
  0x49   :  { %p1414_p6 = pnand %p1412_p5, %p1409_p4 }
  0x4b   :  { %1417 = shalt.err (!%p1414_p6)
}
  0x4c   :  { %s1418_s3 = scalar_lea.vmem %s65_s14, 6144  ;;  %p1423_p8 = scmp.lt.s32.totalorder %s65_s14, %s65_s14 }
  0x4d   :  { %p1419_p7 = scmp.ne.s32.totalorder %s65_s14, %s1418_s3  ;;  %p1424_p9 = scmp.lt.s32.totalorder %s1418_s3, %s1418_s3 }
  0x4f   :  { %p1425_p10 = por %p1424_p9, %p1423_p8 }
  0x51   :  { %p1426_p11 = pnand %p1425_p10, %p1419_p7 }
  0x53   :  { %1429 = shalt.err (!%p1426_p11)
}
  0x54   :  { %70 = dma.hbm_to_vmem [thread:$0]  %s1786_s4, 6144, %s65_s14, [#allocation9], %s1462_s1, %s1462_s1, %s1463_s19  }
  0x55   :  { %1452 = dma.done.wait [#allocation3], 1024  }
  0x56   :  { %1453 = vsyncadd [#allocation3], 4294966272 }
  0x57   :  { %1454 = dma.done.wait [#allocation6], 256  }
  0x58   :  { %1455 = vsyncadd [#allocation6], 4294967040 }
  0x59   :  { %1456 = dma.done.wait [#allocation9], 12288  }
  0x5a   :  { %1457 = vsyncadd [#allocation9], 4294955008  ;;  %v103_v0 = vlaneseq  ;;  %v1469_v1 = vmov 1966171168   ;;  %v96_v8 = vld [vmem:[#allocation5] sm:$0xff]  ;;  %v1595_v20 = vld [vmem:[#allocation2 + $0x10] sm:$0xff] }
  0x5b   :  { %v101_v2 = vunpack.c.l.s4 %v1469_v1  ;;  %v99_v9 = vcombine.high %v96_v8, %v96_v8  ;;  %v1592_v15 = vld [vmem:[#allocation2] sm:$0xff]  ;;  %v1597_v21 = vld [vmem:[#allocation2 + $0x8] sm:$0xff]  ;;  %v1602_v27 = vld [vmem:[#allocation2 + $0x18] sm:$0xff]  ;;  %vm254_vm0 = vcmask 1041409   ;;  %vm256_vm1 = vcmask 1042434  }
  0x5c   :  { %v1583_v3 = vshrl.u32 %v103_v0, 7  ;;  %v221_v4 = vand.u32 127, %v103_v0  ;;  %v1608_v34 = vld [vmem:[#allocation2 + $0x20] sm:$0xff]  ;;  %v1612_v38 = vld [vmem:[#allocation2 + $0x28] sm:$0xff]  ;;  %v1616_v41 = vld [vmem:[#allocation2 + $0x30] sm:$0xff]  ;;  %vm258_vm2 = vcmask 1043459  }
  0x5d   :  { %v102_v5 = vunpack.c.0.s8 %v101_v2  ;;  %v1620_v44 = vld [vmem:[#allocation2 + $0x38] sm:$0xff]  ;;  %vm260_vm3 = vcmask 1044484   ;;  %vm262_vm4 = vcmask 1045509   ;;  %vm264_vm5 = vcmask 1046534  }
  0x5e   :  { %v1586_v6 = vsub.s32 %v221_v4, %v1583_v3  ;;  %v1590_v11 = vsub.s32 0, %v1583_v3  ;;  %vm266_vm6 = vcmask 1047559   ;;  %vm269_vm7 = vcmask 64512  }
  0x5f   :  { %v105_v7 = vsub.s32 %v102_v5, %v1583_v3  ;;  %vm1473_vm8 = vmmov 0  }
  0x61   :  { %v106_v10 = vrot.slane %v96_v8, %v105_v7  ;;  %v113_v14 = vrot.slane %v99_v9, %v105_v7  ;;  %v1470_v9 = vmov 0  }
  0x62   :  { %1276 = vset.pattern.permute.xlu0 %v1470_v9  ;;  %1275 = vset.pattern.permute.xlu1 %v1470_v9 }
  0x63   :  { %v122_v12 = vrot.slane %v106_v10, %v105_v7  ;;  %v114_v13 = vcombine.high %v106_v10, %v106_v10  ;;  %v129_v19 = vrot.slane %v113_v14, %v105_v7  ;;  %v115_v22 = vcombine.high %v113_v14, %v113_v14 }
  0x64   :  { %v1641_v10 = vsub.s32 1, %v1583_v3 }
  0x65   :  { %v151_v16 = vrot.slane %v122_v12, %v1590_v11  ;;  %v144_v17 = vcombine.high %v122_v12, %v122_v12  ;;  %v136_v18 = vrot.slane %v114_v13, %v105_v7  ;;  %v167_v28 = vrot.slane %v129_v19, %v1590_v11 }
  0x66   :  { %v143_v29 = vrot.slane %v115_v22, %v105_v7  ;;  %v145_v33 = vcombine.high %v129_v19, %v129_v19  ;;  %v1644_v12 = vsub.s32 2, %v1583_v3  ;;  %v288_v13 = vsub.s32 3, %v1583_v3 }
  0x67   :  { %v188_v23 = vmul.f32 %v151_v16, %v1592_v15  ;;  %v159_v24 = vrot.slane %v144_v17, %v1590_v11  ;;  %v155_v25 = vrot.slane %v136_v18, %v1590_v11  ;;  %v146_v26 = vcombine.high %v136_v18, %v136_v18 }
  0x68   :  { %v171_v36 = vrot.slane %v143_v29, %v1590_v11  ;;  %v147_v37 = vcombine.high %v143_v29, %v143_v29  ;;  %v192_v39 = vmul.f32 %v167_v28, %v1608_v34  ;;  %v175_v40 = vrot.slane %v145_v33, %v1590_v11 }
  0x69   :  { %196 = vadd.xlane.f32.xlu0 %v188_v23  ;;  %v190_v30 = vmul.f32 %v159_v24, %v1595_v20  ;;  %v189_v31 = vmul.f32 %v155_v25, %v1597_v21  ;;  %v163_v32 = vrot.slane %v146_v26, %v1590_v11  ;;  %v292_v19 = vsub.s32 4, %v1583_v3 }
  0x6a   :  { %v193_v42 = vmul.f32 %v171_v36, %v1612_v38  ;;  %v179_v43 = vrot.slane %v147_v37, %v1590_v11  ;;  %v194_v45 = vmul.f32 %v175_v40, %v1616_v41  ;;  %v296_v29 = vsub.s32 5, %v1583_v3 }
  0x6b   :  { %200 = vadd.xlane.f32.xlu1 %v190_v30  ;;  %v191_v35 = vmul.f32 %v163_v32, %v1602_v27  ;;  %v300_v33 = vsub.s32 6, %v1583_v3 }
  0x6c   :  { %v195_v46 = vmul.f32 %v179_v43, %v1620_v44 }
  0x6d   :  { %198 = vadd.xlane.f32.xlu0 %v189_v31 }
  0x6f   :  { %202 = vadd.xlane.f32.xlu1 %v191_v35 }
  0x71   :  { %204 = vadd.xlane.f32.xlu0 %v192_v39  ;;  %v304_v39 = vsub.s32 7, %v1583_v3 }
  0x73   :  { %206 = vadd.xlane.f32.xlu1 %v193_v42 }
  0x75   :  { %208 = vadd.xlane.f32.xlu0 %v194_v45 }
  0x77   :  { %210 = vadd.xlane.f32.xlu1 %v195_v46 }
  0xf6   :  { %v197_v47 = vpop.xlane.xlu0 %196 }
  0xf7   :  { %v225_v50 = vrot.slane %v197_v47, %v1586_v6 }
  0xf8   :  { %v201_v48 = vpop.xlane.xlu1 %200 }
  0xf9   :  { %v233_v52 = vrot.slane %v201_v48, %v1586_v6 }
  0xfa   :  { %v199_v49 = vpop.xlane.xlu0 %198 }
  0xfb   :  { %v229_v51 = vrot.slane %v199_v49, %v1586_v6 }
  0xfc   :  { %v203_v53 = vpop.xlane.xlu1 %202 }
  0xfd   :  { %v255_v54 = vsel %vm254_vm0, %v229_v51, %v225_v50  ;;  %v237_v55 = vrot.slane %v203_v53, %v1586_v6 }
  0xfe   :  { %v257_v56 = vsel %vm256_vm1, %v233_v52, %v255_v54  ;;  %v205_v57 = vpop.xlane.xlu0 %204 }
  0xff   :  { %v259_v58 = vsel %vm258_vm2, %v237_v55, %v257_v56  ;;  %v241_v59 = vrot.slane %v205_v57, %v1586_v6 }
 0x100   :  { %v207_v60 = vpop.xlane.xlu1 %206 }
 0x101   :  { %v261_v61 = vsel %vm260_vm3, %v241_v59, %v259_v58  ;;  %v245_v62 = vrot.slane %v207_v60, %v1586_v6 }
 0x102   :  { %v209_v63 = vpop.xlane.xlu0 %208 }
 0x103   :  { %v249_v0 = vrot.slane %v209_v63, %v1586_v6  ;;  %v263_v1 = vsel %vm262_vm4, %v245_v62, %v261_v61 }
 0x104   :  { %v211_v2 = vpop.xlane.xlu1 %210 }
 0x105   :  { %v253_v4 = vrot.slane %v211_v2, %v1586_v6  ;;  %v265_v5 = vsel %vm264_vm5, %v249_v0, %v263_v1 }
 0x107   :  { %v267_v7 = vsel %vm266_vm6, %v253_v4, %v265_v5 }
 0x108   :  { %v270_v8 = vsel %vm269_vm7, %v267_v7, -inf }
 0x109   :  { %271 = vmax.xlane.f32.xlu0 %v270_v8 }
 0x196   :  { %v272_v14 = vpop.xlane.xlu0 %271 }
 0x197   :  { %v277_v16 = vrot.slane %v272_v14, %v1590_v11  ;;  %v281_v17 = vrot.slane %v272_v14, %v1641_v10  ;;  %v285_v18 = vrot.slane %v272_v14, %v1644_v12  ;;  %v289_v22 = vrot.slane %v272_v14, %v288_v13 }
 0x198   :  { %v293_v30 = vrot.slane %v272_v14, %v292_v19  ;;  %v297_v35 = vrot.slane %v272_v14, %v296_v29  ;;  %v301_v40 = vrot.slane %v272_v14, %v300_v33 }
 0x199   :  { %v314_v23 = vsub.f32 %v197_v47, %v277_v16  ;;  %v315_v24 = vsub.f32 %v199_v49, %v281_v17  ;;  %v316_v25 = vsub.f32 %v201_v48, %v285_v18  ;;  %v317_v31 = vsub.f32 %v203_v53, %v289_v22 }
 0x19a   :  { %v318_v36 = vsub.f32 %v205_v57, %v293_v30  ;;  %v319_v42 = vsub.f32 %v207_v60, %v297_v35  ;;  %v305_v47 = vrot.slane %v272_v14, %v304_v39  ;;  %v320_v48 = vsub.f32 %v209_v63, %v301_v40 }
 0x19b   :  { %v322_v26 = vmul.f32 1.442695, %v314_v23  ;;  %v324_v28 = vmul.f32 1.442695, %v315_v24  ;;  %v326_v32 = vmul.f32 1.442695, %v316_v25 }
 0x19c   :  { %v328_v37 = vmul.f32 1.442695, %v317_v31  ;;  %v330_v43 = vmul.f32 1.442695, %v318_v36  ;;  %v332_v49 = vmul.f32 1.442695, %v319_v42  ;;  %v321_v51 = vsub.f32 %v211_v2, %v305_v47 }
 0x19d   :  { %1278 = vpow2.f32 %v322_v26  ;;  %v334_v52 = vmul.f32 1.442695, %v320_v48 }
 0x19e   :  { %1280 = vpow2.f32 %v324_v28  ;;  %v336_v54 = vmul.f32 1.442695, %v321_v51 }
 0x19f   :  { %1282 = vpow2.f32 %v326_v32 }
 0x1a0   :  { %1284 = vpow2.f32 %v328_v37 }
 0x1a1   :  { %1286 = vpow2.f32 %v330_v43 }
 0x1a2   :  { %1288 = vpow2.f32 %v332_v49 }
 0x1a3   :  { %1290 = vpow2.f32 %v334_v52 }
 0x1a4   :  { %1292 = vpow2.f32 %v336_v54 }
 0x1a7   :  { %v1279_v45 = vpop.eup %1278 }
 0x1a8   :  { %v1662_v46 = vpop.eup %1280  ;;  %347 = vperm.xlu1 %1275, %v1279_v45  }
 0x1a9   :  { %350 = vperm.xlu0 %1276, %v1662_v46   ;;  %v1667_v50 = vpop.eup %1282 }
 0x1aa   :  { %v1670_v53 = vpop.eup %1284 }
 0x1ab   :  { %v1673_v55 = vpop.eup %1286 }
 0x1ac   :  { %353 = vperm.xlu1 %1275, %v1667_v50   ;;  %v1676_v56 = vpop.eup %1288 }
 0x1ad   :  { %v1679_v57 = vpop.eup %1290 }
 0x1ae   :  { %v1682_v58 = vpop.eup %1292 }
 0x1b0   :  { %356 = vperm.xlu1 %1275, %v1670_v53  }
 0x1b4   :  { %359 = vperm.xlu1 %1275, %v1673_v55  }
 0x1b8   :  { %362 = vperm.xlu1 %1275, %v1676_v56  }
 0x1bc   :  { %365 = vperm.xlu1 %1275, %v1679_v57  }
 0x1c0   :  { %368 = vperm.xlu1 %1275, %v1682_v58  }
 0x227   :  { %v348_v59 = vpop.permute.xlu1 %347 }
 0x228   :  { %v351_v63 = vpop.permute.xlu0 %350  ;;  %v373_v2 = vrot.slane %v348_v59, %v1586_v6  ;;  %v570_v59 = vld [vmem:[#allocation8 + $0x20] sm:$0xff] }
 0x229   :  { %v377_v1 = vrot.slane %v351_v63, %v1586_v6  ;;  %v568_v63 = vld [vmem:[#allocation8 + $0x10] sm:$0xff] }
 0x22b   :  { %v354_v60 = vpop.permute.xlu1 %353  ;;  %v402_v9 = vsel %vm254_vm0, %v377_v1, %v373_v2  ;;  %v573_v1 = vld [vmem:[#allocation8 + $0x38] sm:$0xff] }
 0x22c   :  { %v381_v4 = vrot.slane %v354_v60, %v1586_v6 }
 0x22e   :  { %v403_v16 = vsel %vm256_vm1, %v381_v4, %v402_v9  ;;  %v574_v9 = vld [vmem:[#allocation8 + $0x40] sm:$0xff] }
 0x22f   :  { %v357_v61 = vpop.permute.xlu1 %356 }
 0x230   :  { %v385_v5 = vrot.slane %v357_v61, %v1586_v6 }
 0x232   :  { %v404_v18 = vsel %vm258_vm2, %v385_v5, %v403_v16  ;;  %v572_v5 = vld [vmem:[#allocation8 + $0x30] sm:$0xff] }
 0x233   :  { %v360_v62 = vpop.permute.xlu1 %359 }
 0x234   :  { %v389_v7 = vrot.slane %v360_v62, %v1586_v6  ;;  %v569_v62 = vld [vmem:[#allocation8 + $0x18] sm:$0xff] }
 0x236   :  { %v405_v22 = vsel %vm260_vm3, %v389_v7, %v404_v18  ;;  %v575_v7 = vld [vmem:[#allocation8 + $0x48] sm:$0xff]  ;;  %v582_v18 = vld [vmem:[#allocation8 + $0x80] sm:$0xff] }
 0x237   :  { %v363_v0 = vpop.permute.xlu1 %362 }
 0x238   :  { %v393_v14 = vrot.slane %v363_v0, %v1586_v6  ;;  %v571_v0 = vld [vmem:[#allocation8 + $0x28] sm:$0xff] }
 0x239   :  { %v1175_v3 = vpack.c.bf16 %v571_v0, %v568_v63  ;;  %v603_v0 = vld [vmem:[#allocation8 + $0x128] sm:$0xff] }
 0x23a   :  { %v406_v24 = vsel %vm262_vm4, %v393_v14, %v405_v22  ;;  %v577_v14 = vld [vmem:[#allocation8 + $0x58] sm:$0xff] }
 0x23b   :  { %v366_v8 = vpop.permute.xlu1 %365  ;;  %v1178_v16 = vpack.c.bf16 %v577_v14, %v574_v9  ;;  %v609_v9 = vld [vmem:[#allocation8 + $0x158] sm:$0xff]  ;;  %v612_v14 = vld [vmem:[#allocation8 + $0x170] sm:$0xff] }
 0x23c   :  { %v397_v17 = vrot.slane %v366_v8, %v1586_v6  ;;  %v1148_v8 = vpack.c.bf16 %v575_v7, %v572_v5  ;;  %v1472_v5 = vmov 0.0  }
 0x23d   :  { %711 = vmatprep.mubr.f32.mxu0 %v1472_v5  ;;  %1104 = vmatprep.mubr.msk.f32.mxu1 %vm1473_vm8, %v1472_v5 }
 0x23e   :  { %v407_v26 = vsel %vm264_vm5, %v397_v17, %v406_v24  ;;  %v579_v17 = vld [vmem:[#allocation8 + $0x68] sm:$0xff]  ;;  %v578_v24 = vld [vmem:[#allocation8 + $0x60] sm:$0xff] }
 0x23f   :  { %v369_v23 = vpop.permute.xlu1 %368 }
 0x240   :  { %v401_v25 = vrot.slane %v369_v23, %v1586_v6  ;;  %v1150_v23 = vpack.c.bf16 %v582_v18, %v579_v17  ;;  %v611_v17 = vld [vmem:[#allocation8 + $0x168] sm:$0xff]  ;;  %v610_v18 = vld [vmem:[#allocation8 + $0x160] sm:$0xff] }
 0x242   :  { %v408_v28 = vsel %vm266_vm6, %v401_v25, %v407_v26  ;;  %v581_v25 = vld [vmem:[#allocation8 + $0x78] sm:$0xff] }
 0x243   :  { %v410_v30 = vsel %vm269_vm7, %v408_v28, 0.0  ;;  %v1152_v26 = vpack.c.bf16 %v581_v25, %v578_v24  ;;  %v580_v28 = vld [vmem:[#allocation8 + $0x70] sm:$0xff]  ;;  %v789_v24 = vld [vmem:[#allocation10 + $0x8] sm:$0xff]  ;;  %v792_v25 = vld [vmem:[#allocation10 + $0x20] sm:$0xff] }
 0x244   :  { %411 = vadd.xlane.f32.xlu1 %v410_v30  ;;  %v583_v30 = vld [vmem:[#allocation8 + $0x88] sm:$0xff] }
 0x2d1   :  { %v412_v31 = vpop.xlane.xlu1 %411 }
 0x2d2   :  { %v417_v32 = vrot.slane %v412_v31, %v1590_v11  ;;  %v421_v35 = vrot.slane %v412_v31, %v1641_v10  ;;  %v425_v36 = vrot.slane %v412_v31, %v1644_v12  ;;  %v429_v6 = vrot.slane %v412_v31, %v288_v13 }
 0x2d3   :  { %v433_v40 = vrot.slane %v412_v31, %v292_v19  ;;  %v437_v47 = vrot.slane %v412_v31, %v296_v29  ;;  %v441_v13 = vrot.slane %v412_v31, %v300_v33  ;;  %v445_v19 = vrot.slane %v412_v31, %v304_v39  ;;  %v566_v33 = vld [vmem:[#allocation8] sm:$0xff] }
 0x2d4   :  { %1294 = vrcp.f32 %v417_v32  ;;  %v1181_v31 = vpack.c.bf16 %v583_v30, %v580_v28  ;;  %v1198_v28 = vpack.c.bf16 %v792_v25, %v789_v24 }
 0x2d5   :  { %1296 = vrcp.f32 %v421_v35  ;;  %v588_v35 = vld [vmem:[#allocation8 + $0xb0] sm:$0xff] }
 0x2d6   :  { %1298 = vrcp.f32 %v425_v36 }
 0x2d7   :  { %1300 = vrcp.f32 %v429_v6  ;;  %v584_v6 = vld [vmem:[#allocation8 + $0x90] sm:$0xff] }
 0x2d8   :  { %1302 = vrcp.f32 %v433_v40 }
 0x2d9   :  { %1304 = vrcp.f32 %v437_v47 }
 0x2da   :  { %1306 = vrcp.f32 %v441_v13  ;;  %v590_v13 = vld [vmem:[#allocation8 + $0xc0] sm:$0xff] }
 0x2db   :  { %1308 = vrcp.f32 %v445_v19  ;;  %v592_v19 = vld [vmem:[#allocation8 + $0xd0] sm:$0xff] }
 0x2de   :  { %v1295_v37 = vpop.eup %1294 }
 0x2df   :  { %v455_v42 = vmul.f32 %v1295_v37, %v1279_v45  ;;  %v1297_v43 = vpop.eup %1296  ;;  %v587_v37 = vld [vmem:[#allocation8 + $0xa8] sm:$0xff] }
 0x2e0   :  { %v457_v48 = vmul.f32 %v1297_v43, %v1662_v46  ;;  %v1299_v49 = vpop.eup %1298  ;;  %v567_v46 = vld [vmem:[#allocation8 + $0x8] sm:$0xff]  ;;  %v1156_v40 = vpack.c.bf16 %v587_v37, %v584_v6  ;;  %v589_v43 = vld [vmem:[#allocation8 + $0xb8] sm:$0xff] }
 0x2e1   :  { %472 = vperm.xlu0 %1276, %v455_v42   ;;  %v459_v51 = vmul.f32 %v1299_v49, %v1667_v50  ;;  %v1301_v52 = vpop.eup %1300  ;;  %v1142_v61 = vpack.c.bf16 %v570_v59, %v567_v46  ;;  %v1144_v50 = vpack.c.bf16 %v569_v62, %v566_v33  ;;  %v586_v42 = vld [vmem:[#allocation8 + $0xa0] sm:$0xff]  ;;  %v600_v46 = vld [vmem:[#allocation8 + $0x110] sm:$0xff] }
 0x2e2   :  { %v461_v45 = vmul.f32 %v1301_v52, %v1670_v53  ;;  %v1303_v54 = vpop.eup %1302  ;;  %v1471_v53 = vmov 0.0|0.0   ;;  %v1184_v47 = vpack.c.bf16 %v589_v43, %v586_v42  ;;  %v594_v49 = vld [vmem:[#allocation8 + $0xe0] sm:$0xff] }
 0x2e3   :  { %v463_v29 = vmul.f32 %v1303_v54, %v1673_v55  ;;  %v1305_v60 = vpop.eup %1304  ;;  %1143 = vmatprep.subr.bf16.mxu0 %v1142_v61  ;;  %1174 = vmatprep.subr.bf16.mxu1 %v1471_v53  ;;  %v576_v55 = vld [vmem:[#allocation8 + $0x50] sm:$0xff]  ;;  %v599_v61 = vld [vmem:[#allocation8 + $0x108] sm:$0xff]  ;;  %v598_v62 = vld [vmem:[#allocation8 + $0x100] sm:$0xff] }
 0x2e4   :  { %v465_v39 = vmul.f32 %v1305_v60, %v1676_v56  ;;  %1145 = vmatpush1.bf16.msra.mxu0 %v1144_v50  ;;  %v1307_v2 = vpop.eup %1306  ;;  %1176 = vmatpush3.bf16.msra.mxu1 %v1175_v3  ;;  %v1146_v4 = vpack.c.bf16 %v576_v55, %v573_v1  ;;  %v596_v60 = vld [vmem:[#allocation8 + $0xf0] sm:$0xff]  ;;  %v601_v50 = vld [vmem:[#allocation8 + $0x118] sm:$0xff]  ;;  %v606_v3 = vld [vmem:[#allocation8 + $0x140] sm:$0xff] }
 0x2e5   :  { %477 = vperm.xlu0 %1276, %v457_v48   ;;  %1177 = vmatprep.subr.bf16.mxu1 %v1471_v53  ;;  %v467_v56 = vmul.f32 %v1307_v2, %v1679_v57  ;;  %v1309_v22 = vpop.eup %1308  ;;  %v585_v57 = vld [vmem:[#allocation8 + $0x98] sm:$0xff]  ;;  %v591_v48 = vld [vmem:[#allocation8 + $0xc8] sm:$0xff]  ;;  %v1164_v33 = vpack.c.bf16 %v599_v61, %v596_v60  ;;  %v1190_v63 = vpack.c.bf16 %v601_v50, %v598_v62  ;;  %v604_v2 = vld [vmem:[#allocation8 + $0x130] sm:$0xff] }
 0x2e6   :  { %1147 = vmatprep.subr.bf16.mxu0 %v1146_v4  ;;  %v469_v32 = vmul.f32 %v1309_v22, %v1682_v58  ;;  %v1154_v36 = vpack.c.bf16 %v588_v35, %v585_v57  ;;  %v1158_v58 = vpack.c.bf16 %v594_v49, %v591_v48  ;;  %v1166_v1 = vpack.c.bf16 %v606_v3, %v603_v0  ;;  %v605_v55 = vld [vmem:[#allocation8 + $0x138] sm:$0xff]  ;;  %v607_v4 = vld [vmem:[#allocation8 + $0x148] sm:$0xff] }
 0x2e7   :  { %v613_v22 = vld [vmem:[#allocation8 + $0x178] sm:$0xff] }
 0x2e8   :  { %1149 = vmatpush1.bf16.msra.mxu0 %v1148_v8  ;;  %1179 = vmatpush3.bf16.msra.mxu1 %v1178_v16  ;;  %v1193_v8 = vpack.c.bf16 %v607_v4, %v604_v2  ;;  %v608_v16 = vld [vmem:[#allocation8 + $0x150] sm:$0xff] }
 0x2e9   :  { %482 = vperm.xlu0 %1276, %v459_v51   ;;  %1180 = vmatprep.subr.bf16.mxu1 %v1471_v53  ;;  %v593_v51 = vld [vmem:[#allocation8 + $0xd8] sm:$0xff] }
 0x2ea   :  { %1151 = vmatprep.subr.bf16.mxu0 %v1150_v23  ;;  %v1160_v52 = vpack.c.bf16 %v593_v51, %v590_v13  ;;  %v1172_v23 = vpack.c.bf16 %v611_v17, %v608_v16 }
 0x2ec   :  { %1153 = vmatpush1.bf16.msra.mxu0 %v1152_v26  ;;  %1182 = vmatpush3.bf16.msra.mxu1 %v1181_v31  ;;  %v1196_v26 = vpack.c.bf16 %v613_v22, %v610_v18 }
 0x2ed   :  { %487 = vperm.xlu0 %1276, %v461_v45   ;;  %1183 = vmatprep.subr.bf16.mxu1 %v1471_v53  ;;  %v595_v45 = vld [vmem:[#allocation8 + $0xe8] sm:$0xff] }
 0x2ee   :  { %1155 = vmatprep.subr.bf16.mxu0 %v1154_v36  ;;  %v1187_v54 = vpack.c.bf16 %v595_v45, %v592_v19 }
 0x2f0   :  { %1157 = vmatpush1.bf16.msra.mxu0 %v1156_v40  ;;  %1185 = vmatpush3.bf16.msra.mxu1 %v1184_v47 }
 0x2f1   :  { %492 = vperm.xlu0 %1276, %v463_v29   ;;  %1186 = vmatprep.subr.bf16.mxu1 %v1471_v53  ;;  %v597_v29 = vld [vmem:[#allocation8 + $0xf8] sm:$0xff] }
 0x2f2   :  { %1159 = vmatprep.subr.bf16.mxu0 %v1158_v58  ;;  %v1162_v59 = vpack.c.bf16 %v600_v46, %v597_v29 }
 0x2f4   :  { %1161 = vmatpush1.bf16.msra.mxu0 %v1160_v52  ;;  %1188 = vmatpush3.bf16.msra.mxu1 %v1187_v54 }
 0x2f5   :  { %497 = vperm.xlu0 %1276, %v465_v39   ;;  %1189 = vmatprep.subr.bf16.mxu1 %v1471_v53  ;;  %v602_v39 = vld [vmem:[#allocation8 + $0x120] sm:$0xff] }
 0x2f6   :  { %1163 = vmatprep.subr.bf16.mxu0 %v1162_v59  ;;  %v1168_v7 = vpack.c.bf16 %v605_v55, %v602_v39 }
 0x2f8   :  { %1165 = vmatpush1.bf16.msra.mxu0 %v1164_v33  ;;  %1191 = vmatpush3.bf16.msra.mxu1 %v1190_v63 }
 0x2f9   :  { %502 = vperm.xlu0 %1276, %v467_v56   ;;  %1192 = vmatprep.subr.bf16.mxu1 %v1471_v53  ;;  %v1170_v56 = vpack.c.bf16 %v612_v14, %v609_v9 }
 0x2fa   :  { %1167 = vmatprep.subr.bf16.mxu0 %v1166_v1 }
 0x2fc   :  { %1169 = vmatpush1.bf16.msra.mxu0 %v1168_v7  ;;  %1194 = vmatpush3.bf16.msra.mxu1 %v1193_v8 }
 0x2fd   :  { %507 = vperm.xlu0 %1276, %v469_v32   ;;  %1171 = vmatprep.subr.bf16.mxu0 %v1170_v56 }
 0x2fe   :  { %1195 = vmatprep.subr.bf16.mxu1 %v1471_v53 }
 0x300   :  { %1173 = vmatpush1.bf16.msra.mxu0 %v1172_v23  ;;  %1197 = vmatpush3.bf16.msra.mxu1 %v1196_v26 }
 0x301   :  { %1199 = vmatprep.subr.bf16.mxu0 %v1198_v28  ;;  %1230 = vmatprep.subr.bf16.mxu1 %v1471_v53 }
 0x360   :  { %v473_v30 = vpop.permute.xlu0 %472 }
 0x361   :  { %v510_v36 = vmul.f32 %v473_v30, %v1592_v15 }
 0x363   :  { %v518_v43 = vrot.slane %v510_v36, 4 }
 0x364   :  { %v478_v31 = vpop.permute.xlu0 %477 }
 0x365   :  { %v511_v57 = vmul.f32 %v478_v31, %v1597_v21  ;;  %v519_v51 = vadd.f32 %v518_v43, %v510_v36 }
 0x367   :  { %v524_v37 = vrot.slane %v511_v57, 4  ;;  %v520_v29 = vrot.slane %v519_v51, 2 }
 0x368   :  { %v483_v32 = vpop.permute.xlu0 %482 }
 0x369   :  { %v512_v35 = vmul.f32 %v483_v32, %v1595_v20  ;;  %v525_v49 = vadd.f32 %v524_v37, %v511_v57  ;;  %v521_v50 = vadd.f32 %v520_v29, %v519_v51  ;;  %v788_v57 = vld [vmem:[#allocation10] sm:$0xff]  ;;  %v790_v37 = vld [vmem:[#allocation10 + $0x10] sm:$0xff] }
 0x36b   :  { %v530_v42 = vrot.slane %v512_v35, 4  ;;  %v526_v45 = vrot.slane %v525_v49, 2  ;;  %v522_v8 = vrot.slane %v521_v50, 1 }
 0x36c   :  { %v488_v6 = vpop.permute.xlu0 %487 }
 0x36d   :  { %v513_v40 = vmul.f32 %v488_v6, %v1602_v27  ;;  %v531_v13 = vadd.f32 %v530_v42, %v512_v35  ;;  %v527_v61 = vadd.f32 %v526_v45, %v525_v49  ;;  %v523_v24 = vadd.f32 %v522_v8, %v521_v50  ;;  %v791_v6 = vld [vmem:[#allocation10 + $0x18] sm:$0xff]  ;;  %v805_v50 = vld [vmem:[#allocation10 + $0x88] sm:$0xff]  ;;  %v816_v8 = vld [vmem:[#allocation10 + $0xe0] sm:$0xff] }
 0x36e   :  { %v1200_v51 = vpack.c.bf16 %v791_v6, %v788_v57 }
 0x36f   :  { %v536_v47 = vrot.slane %v513_v40, 4  ;;  %v532_v54 = vrot.slane %v531_v13, 2  ;;  %v528_v55 = vrot.slane %v527_v61, 1 }
 0x370   :  { %v493_v48 = vpop.permute.xlu0 %492 }
 0x371   :  { %v514_v58 = vmul.f32 %v493_v48, %v1608_v34  ;;  %v537_v52 = vadd.f32 %v536_v47, %v513_v40  ;;  %v533_v34 = vadd.f32 %v532_v54, %v531_v13  ;;  %v529_v17 = vadd.f32 %v528_v55, %v527_v61  ;;  %v793_v40 = vld [vmem:[#allocation10 + $0x28] sm:$0xff]  ;;  %v795_v47 = vld [vmem:[#allocation10 + $0x38] sm:$0xff]  ;;  %v798_v48 = vld [vmem:[#allocation10 + $0x50] sm:$0xff] }
 0x372   :  { %v1202_v45 = vpack.c.bf16 %v798_v48, %v795_v47  ;;  %v799_v54 = vld [vmem:[#allocation10 + $0x58] sm:$0xff]  ;;  %v834_v47 = vld [vmem:[#allocation10 + $0x170] sm:$0xff] }
 0x373   :  { %v542_v19 = vrot.slane %v514_v58, 4  ;;  %v538_v46 = vrot.slane %v537_v52, 2  ;;  %v534_v7 = vrot.slane %v533_v34, 1  ;;  %v639_v31 = vsel %vm254_vm0, %v529_v17, %v523_v24  ;;  %v814_v17 = vld [vmem:[#allocation10 + $0xd0] sm:$0xff] }
 0x374   :  { %v498_v21 = vpop.permute.xlu0 %497  ;;  %v818_v24 = vld [vmem:[#allocation10 + $0xf0] sm:$0xff] }
 0x375   :  { %v543_v20 = vadd.f32 %v542_v19, %v514_v58  ;;  %v515_v15 = vmul.f32 %v498_v21, %v1612_v38  ;;  %v539_v63 = vadd.f32 %v538_v46, %v537_v52  ;;  %v535_v23 = vadd.f32 %v534_v7, %v533_v34  ;;  %v794_v52 = vld [vmem:[#allocation10 + $0x30] sm:$0xff]  ;;  %v801_v46 = vld [vmem:[#allocation10 + $0x68] sm:$0xff] }
 0x376   :  { %v1231_v19 = vpack.c.bf16 %v793_v40, %v790_v37  ;;  %v802_v34 = vld [vmem:[#allocation10 + $0x70] sm:$0xff]  ;;  %v813_v7 = vld [vmem:[#allocation10 + $0xc8] sm:$0xff]  ;;  %v827_v37 = vld [vmem:[#allocation10 + $0x138] sm:$0xff] }
 0x377   :  { %v548_v27 = vrot.slane %v515_v15, 4  ;;  %v544_v59 = vrot.slane %v543_v20, 2  ;;  %v540_v9 = vrot.slane %v539_v63, 1  ;;  %v640_v35 = vsel %vm256_vm1, %v535_v23, %v639_v31  ;;  %v823_v31 = vld [vmem:[#allocation10 + $0x118] sm:$0xff]  ;;  %v826_v40 = vld [vmem:[#allocation10 + $0x130] sm:$0xff] }
 0x378   :  { %v503_v60 = vpop.permute.xlu0 %502 }
 0x379   :  { %v549_v33 = vadd.f32 %v548_v27, %v515_v15  ;;  %v516_v62 = vmul.f32 %v503_v60, %v1616_v41  ;;  %v545_v39 = vadd.f32 %v544_v59, %v543_v20  ;;  %v541_v25 = vadd.f32 %v540_v9, %v539_v63  ;;  %v797_v20 = vld [vmem:[#allocation10 + $0x48] sm:$0xff]  ;;  %v796_v15 = vld [vmem:[#allocation10 + $0x40] sm:$0xff]  ;;  %v807_v63 = vld [vmem:[#allocation10 + $0x98] sm:$0xff] }
 0x37a   :  { %v804_v27 = vld [vmem:[#allocation10 + $0x80] sm:$0xff]  ;;  %v1204_v59 = vpack.c.bf16 %v797_v20, %v794_v52  ;;  %v1234_v61 = vpack.c.bf16 %v799_v54, %v796_v15  ;;  %v97_v20 = vld [vmem:[#allocation7] sm:$0xff] }
 0x37b   :  { %v550_v0 = vrot.slane %v549_v33, 2  ;;  %v554_v3 = vrot.slane %v516_v62, 4  ;;  %v546_v56 = vrot.slane %v545_v39, 1  ;;  %v641_v43 = vsel %vm258_vm2, %v541_v25, %v640_v35  ;;  %v800_v60 = vld [vmem:[#allocation10 + $0x60] sm:$0xff] }
 0x37c   :  { %v508_v1 = vpop.permute.xlu0 %507  ;;  %v824_v35 = vld [vmem:[#allocation10 + $0x120] sm:$0xff] }
 0x37d   :  { %v551_v2 = vadd.f32 %v550_v0, %v549_v33  ;;  %v555_v38 = vadd.f32 %v554_v3, %v516_v62  ;;  %v517_v4 = vmul.f32 %v508_v1, %v1620_v44  ;;  %v547_v30 = vadd.f32 %v546_v56, %v545_v39  ;;  %v803_v62 = vld [vmem:[#allocation10 + $0x78] sm:$0xff]  ;;  %v810_v0 = vld [vmem:[#allocation10 + $0xb0] sm:$0xff]  ;;  %v832_v52 = vld [vmem:[#allocation10 + $0x160] sm:$0xff] }
 0x37e   :  { %v1206_v33 = vpack.c.bf16 %v804_v27, %v801_v46  ;;  %v1208_v3 = vpack.c.bf16 %v803_v62, %v800_v60  ;;  %v806_v39 = vld [vmem:[#allocation10 + $0x90] sm:$0xff]  ;;  %v1237_v1 = vpack.c.bf16 %v805_v50, %v802_v34  ;;  %v1210_v55 = vpack.c.bf16 %v810_v0, %v807_v63  ;;  %v815_v56 = vld [vmem:[#allocation10 + $0xd8] sm:$0xff] }
 0x37f   :  { %v556_v14 = vrot.slane %v555_v38, 2  ;;  %v560_v16 = vrot.slane %v517_v4, 4  ;;  %v552_v41 = vrot.slane %v551_v2, 1  ;;  %v642_v49 = vsel %vm260_vm3, %v547_v30, %v641_v43  ;;  %v820_v30 = vld [vmem:[#allocation10 + $0x100] sm:$0xff]  ;;  %v831_v43 = vld [vmem:[#allocation10 + $0x158] sm:$0xff] }
 0x380   :  { %v1224_v48 = vpack.c.bf16 %v827_v37, %v824_v35  ;;  %v614_v46 = vld [vmem:[%s1787_s5] ss:$2 sm:$0x7] }
 0x381   :  { %v557_v18 = vadd.f32 %v556_v14, %v555_v38  ;;  %v561_v22 = vadd.f32 %v560_v16, %v517_v4  ;;  %v553_v32 = vadd.f32 %v552_v41, %v551_v2  ;;  %v809_v2 = vld [vmem:[#allocation10 + $0xa8] sm:$0xff]  ;;  %v808_v38 = vld [vmem:[#allocation10 + $0xa0] sm:$0xff]  ;;  %v811_v4 = vld [vmem:[#allocation10 + $0xb8] sm:$0xff]  ;;  %v619_v27 = vrot.slane %v614_v46, %v1590_v11 }
 0x382   :  { %v1212_v9 = vpack.c.bf16 %v809_v2, %v806_v39  ;;  %v812_v14 = vld [vmem:[#allocation10 + $0xc0] sm:$0xff]  ;;  %v1240_v16 = vpack.c.bf16 %v811_v4, %v808_v38  ;;  %v817_v41 = vld [vmem:[#allocation10 + $0xe8] sm:$0xff] }
 0x383   :  { %v558_v26 = vrot.slane %v557_v18, 1  ;;  %v562_v28 = vrot.slane %v561_v22, 2  ;;  %v643_v13 = vsel %vm262_vm4, %v553_v32, %v642_v49  ;;  %v1216_v23 = vpack.c.bf16 %v815_v56, %v812_v14  ;;  %v825_v32 = vld [vmem:[#allocation10 + $0x128] sm:$0xff]  ;;  %v830_v49 = vld [vmem:[#allocation10 + $0x150] sm:$0xff] }
 0x384   :  { %v1243_v25 = vpack.c.bf16 %v817_v41, %v814_v17 }
 0x385   :  { %v563_v44 = vadd.f32 %v562_v28, %v561_v22  ;;  %v559_v36 = vadd.f32 %v558_v26, %v557_v18  ;;  %v819_v18 = vld [vmem:[#allocation10 + $0xf8] sm:$0xff]  ;;  %v822_v22 = vld [vmem:[#allocation10 + $0x110] sm:$0xff]  ;;  %v821_v28 = vld [vmem:[#allocation10 + $0x108] sm:$0xff] }
 0x386   :  { %v1218_v26 = vpack.c.bf16 %v822_v22, %v819_v18  ;;  %v1220_v57 = vpack.c.bf16 %v821_v28, %v818_v24 }
 0x387   :  { %v564_v42 = vrot.slane %v563_v44, 1  ;;  %v644_v21 = vsel %vm264_vm5, %v559_v36, %v643_v13  ;;  %v1246_v36 = vpack.c.bf16 %v823_v31, %v820_v30  ;;  %v1226_v13 = vpack.c.bf16 %v834_v47, %v831_v43 }
 0x389   :  { %v565_v58 = vadd.f32 %v564_v42, %v563_v44  ;;  %v828_v44 = vld [vmem:[#allocation10 + $0x140] sm:$0xff]  ;;  %v829_v42 = vld [vmem:[#allocation10 + $0x148] sm:$0xff] }
 0x38a   :  { %v1222_v6 = vpack.c.bf16 %v828_v44, %v825_v32 }
 0x38b   :  { %v645_v29 = vsel %vm266_vm6, %v565_v58, %v644_v21  ;;  %v1249_v58 = vpack.c.bf16 %v829_v42, %v826_v40 }
 0x38c   :  { %712 = vmatmul.mubr.f32.vlgmr.msra.gmra.mrb[0].mxu0 %v645_v29  ;;  %1017 = vst [vmem:[#allocation11 + $0x8] sm:$0xff] %v645_v29  ;;  %1105 = vmatmul.mubr.f32.vlgmr.msra.gmra.mrb[0].mxu1 %v645_v29  ;;  %v1035_v29 = vld [vmem:[%s1787_s5 + $0x1] ss:$2 sm:$0x7]  ;;  %s1474_s5 = smov [#allocation11]  }
 0x38d   :  { %1201 = vmatpush1.bf16.msra.mxu0 %v1200_v51  ;;  %1232 = vmatpush3.bf16.msra.mxu1 %v1231_v19  ;;  %v833_v51 = vld [vmem:[#allocation10 + $0x168] sm:$0xff]  ;;  %v835_v19 = vld [vmem:[#allocation10 + $0x178] sm:$0xff]  ;;  %v846_v60 = vrot.slane %v1035_v29, %v1641_v10  ;;  %s1024_s10 = sshll.u32 %s1474_s5, 4  ;;  %s1025_s10 = int_to_ptr.vmem [resolvable:$true] %s1024_s10 }
 0x38e   :  { %1203 = vmatprep.subr.bf16.mxu0 %v1202_v45  ;;  %1233 = vmatprep.subr.bf16.mxu1 %v1471_v53  ;;  %v1228_v21 = vpack.c.bf16 %v833_v51, %v830_v49  ;;  %v1252_v45 = vpack.c.bf16 %v835_v19, %v832_v52  ;;  %s1430_s11 = scalar_lea.vmem %s1025_s10, 256  ;;  %p1435_p13 = scmp.lt.s32.totalorder %s1025_s10, %s1025_s10 }
 0x38f   :  { %918 = vmatprep.mubr.f32.mxu0 %v1472_v5  ;;  %1139 = vmatprep.mubr.msk.f32.mxu1 %vm1473_vm8, %v1472_v5  ;;  %v1214_v5 = vpack.c.bf16 %v816_v8, %v813_v7  ;;  %p1431_p12 = scmp.ne.s32.totalorder %s1025_s10, %s1430_s11  ;;  %p1436_p0 = scmp.lt.s32.totalorder %s1430_s11, %s1430_s11 }
 0x391   :  { %1205 = vmatpush1.bf16.msra.mxu0 %v1204_v59  ;;  %1235 = vmatpush3.bf16.msra.mxu1 %v1234_v61  ;;  %v842_v59 = vrot.slane %v1035_v29, %v1590_v11  ;;  %v850_v11 = vrot.slane %v1035_v29, %v1644_v12  ;;  %p1437_p1 = por %p1436_p0, %p1435_p13 }
 0x392   :  { %1207 = vmatprep.subr.bf16.mxu0 %v1206_v33  ;;  %1236 = vmatprep.subr.bf16.mxu1 %v1471_v53 }
 0x393   :  { %v1254_v61 = vadd.f32 %v842_v59, %v619_v27  ;;  %p1438_p2 = pnand %p1437_p1, %p1431_p12 }
 0x395   :  { %1209 = vmatpush1.bf16.msra.mxu0 %v1208_v3  ;;  %1238 = vmatpush3.bf16.msra.mxu1 %v1237_v1 }
 0x396   :  { %1211 = vmatprep.subr.bf16.mxu0 %v1210_v55  ;;  %1239 = vmatprep.subr.bf16.mxu1 %v1471_v53 }
 0x399   :  { %1213 = vmatpush1.bf16.msra.mxu0 %v1212_v9  ;;  %1241 = vmatpush3.bf16.msra.mxu1 %v1240_v16 }
 0x39a   :  { %1215 = vmatprep.subr.bf16.mxu0 %v1214_v5  ;;  %1242 = vmatprep.subr.bf16.mxu1 %v1471_v53 }
 0x39d   :  { %1217 = vmatpush1.bf16.msra.mxu0 %v1216_v23  ;;  %1244 = vmatpush3.bf16.msra.mxu1 %v1243_v25 }
 0x39e   :  { %1219 = vmatprep.subr.bf16.mxu0 %v1218_v26  ;;  %1245 = vmatprep.subr.bf16.mxu1 %v1471_v53 }
 0x3a1   :  { %1221 = vmatpush1.bf16.msra.mxu0 %v1220_v57  ;;  %1247 = vmatpush3.bf16.msra.mxu1 %v1246_v36 }
 0x3a2   :  { %1223 = vmatprep.subr.bf16.mxu0 %v1222_v6  ;;  %1248 = vmatprep.subr.bf16.mxu1 %v1471_v53 }
 0x3a5   :  { %1225 = vmatpush1.bf16.msra.mxu0 %v1224_v48  ;;  %1250 = vmatpush3.bf16.msra.mxu1 %v1249_v58 }
 0x3a6   :  { %1227 = vmatprep.subr.bf16.mxu0 %v1226_v13  ;;  %1251 = vmatprep.subr.bf16.mxu1 %v1471_v53  ;;  %v623_v53 = vrot.slane %v614_v46, %v1641_v10  ;;  %v627_v10 = vrot.slane %v614_v46, %v1644_v12 }
 0x3a8   :  { %v1256_v62 = vadd.f32 %v846_v60, %v623_v53 }
 0x3a9   :  { %1229 = vmatpush1.bf16.msra.mxu0 %v1228_v21  ;;  %1253 = vmatpush3.bf16.msra.mxu1 %v1252_v45 }
 0x3ac   :  { %919 = vmatmul.mubr.f32.vlgmr.msra.gmra.mrb[0].mxu0 %v97_v20  ;;  %1140 = vmatmul.mubr.f32.vlgmr.msra.gmra.mrb[2].mxu1 %v97_v20 }
 0x45f   :  { %v784_v15 = vpop.f32.mrb[0].mxu1 }
 0x460   :  { %v1106_v54 = vpop.f32.mrb[1].mxu1  ;;  %v785_v9 = vadd.f32 %v784_v15, %v627_v10 }
 0x47f   :  { %v920_v33 = vpop.f32.mrb[0].mxu0  ;;  %v991_v34 = vpop.f32.mrb[2].mxu1 }
 0x480   :  { %v1255_v50 = vadd.f32 %v1254_v61, %v920_v33  ;;  %v922_v63 = vpop.f32.mrb[1].mxu0  ;;  %v1141_v0 = vpop.f32.mrb[3].mxu1  ;;  %v992_v7 = vadd.f32 %v991_v34, %v850_v11 }
 0x481   :  { %v1257_v39 = vadd.f32 %v1256_v62, %v922_v63 }
 0x482   :  { %v1036_v3 = vmul.f32 -1.442695, %v1255_v50 }
 0x483   :  { %v1037_v1 = vmul.f32 -1.442695, %v1257_v39 }
 0x484   :  { %1310 = vpow2.f32 %v1036_v3 }
 0x485   :  { %1312 = vpow2.f32 %v1037_v1 }
 0x48e   :  { %v1311_v55 = vpop.eup %1310 }
 0x48f   :  { %v999_v2 = vadd.f32 1.0, %v1311_v55  ;;  %v1313_v38 = vpop.eup %1312 }
 0x490   :  { %v1006_v4 = vadd.f32 1.0, %v1313_v38 }
 0x491   :  { %1314 = vrcp.f32 %v999_v2 }
 0x492   :  { %1316 = vrcp.f32 %v1006_v4 }
 0x49b   :  { %v1315_v8 = vpop.eup %1314 }
 0x49c   :  { %v1009_v14 = vmul.f32 %v1315_v8, %v992_v7  ;;  %v1317_v5 = vpop.eup %1316 }
 0x49d   :  { %v1012_v56 = vsub.f32 1.0, %v1317_v5  ;;  %v1014_v18 = vmul.f32 %v1317_v5, %v97_v20 }
 0x49e   :  { %v1010_v16 = vadd.f32 %v1009_v14, %v785_v9 }
 0x4a0   :  { %1318 = vtanh.f32 %v1010_v16 }
 0x4aa   :  { %v1319_v17 = vpop.eup %1318 }
 0x4ab   :  { %v1013_v41 = vmul.f32 %v1319_v17, %v1012_v56 }
 0x4ad   :  { %v1015_v22 = vadd.f32 %v1014_v18, %v1013_v41 }
 0x4af   :  { %1016 = vst [vmem:[#allocation11] sm:$0xff] %v1015_v22 }
 0x4b0   :  { %1441 = shalt.err (!%p1438_p2)
}
 0x4b1   :  { %s1442_s14 = scalar_lea.hbm %s1788_s6, 256 }
 0x4b2   :  { %p1443_p3 = scmp.ne.s32.totalorder %s1788_s6, %s1442_s14  ;;  %p1446_p4 = scmp.lt.u32.totalorder %s1442_s14, %s1788_s6 }
 0x4b4   :  { %p1448_p5 = pnand %p1446_p4, %p1443_p3 }
 0x4b6   :  { %1451 = shalt.err (!%p1448_p5)
}
 0x4b7   :  { %1027 = dma.vmem_to_hbm [thread:$0]  %s1025_s10, 256, %s1788_s6, [#allocation4]  }
 0x4b8   :  { %1458 = dma.done.wait [#allocation4], 256  }
 0x4b9   :  { %1459 = vsyncadd [#allocation4], 4294967040 }
 0x4ba   :  { %1031 = vsyncpa [#allocation3], 1 }
 0x4bb   :  { %1032 = vsyncpa [#allocation6], 1 }
 0x4bc   :  { %1033 = vsyncpa [#allocation9], 1 }
 0x4bd   :  { %1034 = vsyncpa [#allocation4], 1 }

</bundles_post_ra>
